<compile_context>
chip_gen: v7x
topology: tpu7x:2x2x1
jax: 0.10.0
libtpu: 0.0.40
codegen_flags: <defaults>
</compile_context>

<pallas_src>
import jax
import jax.numpy as jnp
from jax import lax
from jax.experimental import pallas as pl
from jax.experimental.pallas import tpu as pltpu

_VMEM_LIMIT_BYTES = 48 * 1024 * 1024   # > scoped defaults, < v7x 64 MiB physical
_TILE_BUDGET_BYTES = 24 * 1024 * 1024  # target for double-buffered tiles


# ----------------------------------------------------------------------------
# Kernel 1: serial recurrence.  Grid = (batch blocks [parallel], time chunks
# [arbitrary]).  Hidden state carried in a VMEM scratch across time chunks.
# ----------------------------------------------------------------------------
def rnn_recurrence_kernel(xproj_ref, whh_ref, h_all_ref, h_carry):
    # xproj_ref : (TB, T, H_p)   precomputed W_xh[X] + b_h chunk (compute dtype)
    # whh_ref   : (H_p, H_p)     recurrent weights (compute dtype)
    # h_all_ref : (TB, T, H_p)   hidden states for this chunk (output, compute dtype)
    # h_carry   : (TB, H_p)      f32 VMEM scratch, carried across the time axis

    @pl.when(pl.program_id(1) == 0)
    def _():
        # state=None in PyTorch -> zero-initialized hidden state per batch block.
        h_carry[...] = jnp.zeros_like(h_carry)

    T = xproj_ref.shape[1]  # static chunk size
    h = h_carry[...]
    for t in range(T):  # serial dependence; W_hh read from the ref each step
        pre = xproj_ref[:, t, :].astype(jnp.float32) + jnp.dot(
            h.astype(whh_ref.dtype), whh_ref[...],
            preferred_element_type=jnp.float32)
        h = jnp.tanh(pre)
        h_all_ref[:, t, :] = h.astype(h_all_ref.dtype)
    h_carry[...] = h


# ----------------------------------------------------------------------------
# Kernel 2: output projection, one GEMM tiled over (M = batch*seq, N = vocab).
# ----------------------------------------------------------------------------
def output_projection_kernel(h_ref, whq_ref, bq_ref, y_ref):
    # h_ref : (TM, H_p), whq_ref : (H_p, TN), bq_ref : (1, TN), y_ref : (TM, TN)
    y_ref[...] = (
        jnp.dot(h_ref[...], whq_ref[...], preferred_element_type=jnp.float32)
        + bq_ref[...]
    ).astype(y_ref.dtype)


# ----------------------------------------------------------------------------
# Tiling helpers (VMEM-budget aware, (8,128)-friendly).
# ----------------------------------------------------------------------------
def _round_up(x, m):
    return ((x + m - 1) // m) * m


def _largest_aligned_divisor(total, cap, step):
    cap = max(step, min(cap, total))
    cap = (cap // step) * step
    for d in range(cap, step - 1, -step):
        if total % d == 0:
            return d
    return step


def _pick_batch_tile(b_p):
    # >=2 batch blocks lets the 'parallel' axis ride both TensorCores on v7x;
    # neutral on v5e/v6e (single TC), where small batches keep one block.
    if b_p >= 16 and (b_p // 2) % 8 == 0:
        return b_p // 2
    return b_p


def _pick_time_chunk(seq_len, tb, h_p, act_bytes, budget_bytes, cap=32):
    # Per grid step: double-buffered (in + out) activation blocks + double-buffered
    # W_hh + the f32 carry scratch.
    fixed = 2 * h_p * h_p * act_bytes + tb * h_p * 4
    per_t = 2 * 2 * tb * h_p * act_bytes
    t_budget = max(8, (budget_bytes - fixed) // max(per_t, 1))
    t = min(cap, t_budget, _round_up(seq_len, 8))
    t = max(8, (t // 8) * 8)
    return t


def _pick_gemm_tiles(m, k, n, a_bytes, b_bytes, budget_bytes, tm_cap=512, tn_cap=2048):
    tm = _largest_aligned_divisor(m, tm_cap, 8)
    tn = _largest_aligned_divisor(n, tn_cap, 128)

    def vmem(tm_, tn_):
        return 2 * (tm_ * k * a_bytes + k * tn_ * b_bytes + tm_ * tn_ * 4)

    while vmem(tm, tn) > budget_bytes and tn > 128:
        tn = _largest_aligned_divisor(n, tn - 128, 128)
    while vmem(tm, tn) > budget_bytes and tm > 8:
        tm = _largest_aligned_divisor(m, tm - 8, 8)
    return tm, tn


# ----------------------------------------------------------------------------
# Forward pass.
# ----------------------------------------------------------------------------
def rnnlm_forward(X, W_xh, W_hh, b_h, W_hq, b_q, vocab_size,
                  compute_dtype=jnp.float32):
    """X: (batch, seq) int32 token ids. Returns (batch, seq, vocab) float32."""
    batch, seq = X.shape
    num_hiddens = W_xh.shape[1]
    act_bytes = jnp.dtype(compute_dtype).itemsize
    f32 = jnp.float32

    # Padded, hardware-friendly shapes (zero padding is exact; results sliced back).
    H_p = _round_up(num_hiddens, 128)
    V_p = _round_up(vocab_size, 128)
    B_p = _round_up(batch, 8)
    TB = _pick_batch_tile(B_p)
    T = _pick_time_chunk(seq, TB, H_p, act_bytes, _TILE_BUDGET_BYTES)
    S_p = _round_up(seq, T)

    W_xh_p = jnp.pad(W_xh.astype(f32), ((0, 0), (0, H_p - num_hiddens)))
    W_hh_p = jnp.pad(W_hh.astype(f32),
                     ((0, H_p - num_hiddens), (0, H_p - num_hiddens)))
    b_h_p = jnp.pad(b_h.astype(f32), (0, H_p - num_hiddens))
    W_hq_p = jnp.pad(W_hq.astype(f32),
                     ((0, H_p - num_hiddens), (0, V_p - vocab_size)))
    b_q_p = jnp.pad(b_q.astype(f32), (0, V_p - vocab_size)).reshape(1, V_p)
    X_p = jnp.pad(X, ((0, B_p - batch), (0, S_p - seq)))

    # Token-id gather + folded bias == one_hot(X) @ W_xh + b_h (exact row select;
    # mode='fill' reproduces one_hot's all-zero row for out-of-range ids).
    x_proj = jnp.take(W_xh_p, X_p, axis=0, mode="fill", fill_value=0.0) + b_h_p
    x_proj = x_proj.astype(compute_dtype)          # (B_p, S_p, H_p)

    # --- Stage 1: serial recurrence (batch-parallel outer, time-carry inner) ---
    h_all = pl.pallas_call(
        rnn_recurrence_kernel,
        out_shape=jax.ShapeDtypeStruct((B_p, S_p, H_p), compute_dtype),
        grid_spec=pltpu.PrefetchScalarGridSpec(
            num_scalar_prefetch=0,
            grid=(B_p // TB, S_p // T),
            in_specs=[
                pl.BlockSpec((TB, T, H_p), lambda b, c: (b, c, 0)),
                pl.BlockSpec((H_p, H_p), lambda b, c: (0, 0)),
            ],
            out_specs=pl.BlockSpec((TB, T, H_p), lambda b, c: (b, c, 0)),
            scratch_shapes=[pltpu.VMEM((TB, H_p), jnp.float32)],
        ),
        compiler_params=pltpu.CompilerParams(
            dimension_semantics=("parallel", "arbitrary"),
            vmem_limit_bytes=_VMEM_LIMIT_BYTES,
        ),
    )(x_proj, W_hh_p.astype(compute_dtype))

    # --- Stage 2: output projection, lane-dense GEMM tiled over (M, N) ---
    M = B_p * S_p
    TM, TN = _pick_gemm_tiles(M, H_p, V_p, act_bytes, act_bytes, _TILE_BUDGET_BYTES)
    h_flat = h_all.reshape(M, H_p)                 # contiguous batch-major view

    y_flat = pl.pallas_call(
        output_projection_kernel,
        out_shape=jax.ShapeDtypeStruct((M, V_p), jnp.float32),
        grid_spec=pltpu.PrefetchScalarGridSpec(
            num_scalar_prefetch=0,
            grid=(M // TM, V_p // TN),             # M outer / N inner: h tile reused
            in_specs=[
                pl.BlockSpec((TM, H_p), lambda i, j: (i, 0)),
                pl.BlockSpec((H_p, TN), lambda i, j: (0, j)),
                pl.BlockSpec((1, TN), lambda i, j: (0, j)),
            ],
            out_specs=pl.BlockSpec((TM, TN), lambda i, j: (i, j)),
        ),
        compiler_params=pltpu.CompilerParams(
            dimension_semantics=("parallel", "parallel"),
            vmem_limit_bytes=_VMEM_LIMIT_BYTES,
        ),
    )(h_flat, W_hq_p.astype(compute_dtype), b_q_p)

    # Free contiguous view back to (batch, seq, vocab); strip padding.
    y = y_flat.reshape(B_p, S_p, V_p)
    return y[:batch, :seq, :vocab_size]


# ----------------------------------------------------------------------------
# Pure-JAX reference (identical PyTorch semantics) for verification.
# ----------------------------------------------------------------------------
def rnnlm_forward_ref(X, W_xh, W_hh, b_h, W_hq, b_q, vocab_size):
    hi = lax.Precision.HIGHEST
    embs = jax.nn.one_hot(X.T, vocab_size, dtype=jnp.float32)  # (seq, batch, vocab)
    batch = X.shape[0]
    H = jnp.zeros((batch, W_xh.shape[1]), jnp.float32)
    outs = []
    for t in range(embs.shape[0]):
        H = jnp.tanh(jnp.dot(embs[t], W_xh, precision=hi)
                     + jnp.dot(H, W_hh, precision=hi) + b_h)
        outs.append(jnp.dot(H, W_hq, precision=hi) + b_q)
    return jnp.stack(outs, axis=1)


if __name__ == "__main__":
    # Small, shape-consistent configuration.
    batch, seq = 8, 8
    vocab_size, num_hiddens = 32, 32
    sigma = 0.01

    key = jax.random.PRNGKey(0)
    k_x, k_wxh, k_whh, k_whq = jax.random.split(key, 4)

    W_xh = (jax.random.normal(k_wxh, (vocab_size, num_hiddens)) * sigma).astype(jnp.float32)
    W_hh = (jax.random.normal(k_whh, (num_hiddens, num_hiddens)) * sigma).astype(jnp.float32)
    b_h = jnp.zeros((num_hiddens,), jnp.float32)
    W_hq = (jax.random.normal(k_whq, (num_hiddens, vocab_size)) * sigma).astype(jnp.float32)
    b_q = jnp.zeros((vocab_size,), jnp.float32)

    X = jax.random.randint(k_x, (batch, seq), 0, vocab_size, dtype=jnp.int32)

    ref = rnnlm_forward_ref(X, W_xh, W_hh, b_h, W_hq, b_q, vocab_size)

    # f32 path: strict parity with the reference semantics.
    out = rnnlm_forward(X, W_xh, W_hh, b_h, W_hq, b_q, vocab_size,
                        compute_dtype=jnp.float32)
    out = jax.block_until_ready(out)
    assert out.shape == (batch, seq, vocab_size), out.shape
    assert jnp.allclose(out, ref, atol=1e-5, rtol=1e-5), "f32 mismatch vs reference"

    # bf16 MXU perf path (v6e/v7x native): looser tolerance by construction.
    out_bf16 = rnnlm_forward(X, W_xh, W_hh, b_h, W_hq, b_q, vocab_size,
                             compute_dtype=jnp.bfloat16)
    out_bf16 = jax.block_until_ready(out_bf16)
    assert jnp.allclose(out_bf16, ref, atol=1e-3, rtol=2e-2), "bf16 mismatch vs reference"

    print("KERNEL_OK")
</pallas_src>

<mosaic_0001>
module attributes {stable_mosaic.version = 11 : i64} {
  func.func @rnn_recurrence_kernel(%arg0: i32, %arg1: i32, %arg2: memref<8x8x128xf32, #tpu.memory_space<vmem>>, %arg3: memref<128x128xf32, #tpu.memory_space<vmem>>, %arg4: memref<8x8x128xf32, #tpu.memory_space<vmem>>, %arg5: memref<8x128xf32, #tpu.memory_space<vmem>>) attributes {dimension_semantics = [#tpu.dimension_semantics<parallel>, #tpu.dimension_semantics<arbitrary>], iteration_bounds = array<i64: 1, 1>, scalar_prefetch = 0 : i64, scratch_operands = 1 : i64, tpu.core_type = #tpu.core_type<tc>, window_params = [{transform_indices = @transform_0, window_bounds = array<i64: 8, 8, 128>}, {pipeline_mode = #tpu.pipeline_mode<synchronous>, transform_indices = @transform_1, window_bounds = array<i64: 128, 128>}, {transform_indices = @transform_2, window_bounds = array<i64: 8, 8, 128>}]} {
    %c0_i32 = arith.constant 0 : i32
    %0 = arith.cmpi eq, %arg1, %c0_i32 : i32
    %1 = arith.extui %0 : i1 to i32
    %c0_i32_0 = arith.constant 0 : i32
    %2 = arith.cmpi ne, %1, %c0_i32_0 : i32
    scf.if %2 {
      %cst_68 = arith.constant 0.000000e+00 : f32
      %77 = vector.broadcast %cst_68 : f32 to vector<8x128xf32>
      %c0_69 = arith.constant 0 : index
      %c0_70 = arith.constant 0 : index
      %78 = vector.load %arg5[%c0_69, %c0_70] : memref<8x128xf32, #tpu.memory_space<vmem>>, vector<8x128xf32>
      tpu.vector_store %arg5[%c0_69, %c0_70], %77 {strides = array<i32>} : memref<8x128xf32, #tpu.memory_space<vmem>>, vector<8x128xf32>,
    } else {
    }
    %c0 = arith.constant 0 : index
    %c0_1 = arith.constant 0 : index
    %3 = vector.load %arg5[%c0, %c0_1] : memref<8x128xf32, #tpu.memory_space<vmem>>, vector<8x128xf32>
    %c0_2 = arith.constant 0 : index
    %c0_3 = arith.constant 0 : index
    %c0_4 = arith.constant 0 : index
    %4 = vector.load %arg2[%c0_2, %c0_3, %c0_4] : memref<8x8x128xf32, #tpu.memory_space<vmem>>, vector<8x1x128xf32>
    %5 = vector.shape_cast %4 : vector<8x1x128xf32> to vector<8x128xf32>
    %c0_5 = arith.constant 0 : index
    %c0_6 = arith.constant 0 : index
    %6 = vector.load %arg3[%c0_5, %c0_6] : memref<128x128xf32, #tpu.memory_space<vmem>>, vector<128x128xf32>
    %cst = arith.constant dense<0.000000e+00> : vector<8x128xf32>
    %7 = tpu.matmul %3, %6, %cst {dimension_numbers = #tpu.dot_dimension_numbers<[1], [0], [0], [1], [0, 0, 1, 1], [], []>} : vector<8x128xf32>, vector<128x128xf32>, vector<8x128xf32> -> vector<8x128xf32>
    %8 = arith.addf %5, %7 : vector<8x128xf32>
    %9 = math.tanh %8 : vector<8x128xf32>
    %c0_7 = arith.constant 0 : index
    %c0_8 = arith.constant 0 : index
    %c0_9 = arith.constant 0 : index
    %10 = vector.load %arg4[%c0_7, %c0_8, %c0_9] : memref<8x8x128xf32, #tpu.memory_space<vmem>>, vector<8x1x128xf32>
    %11 = vector.shape_cast %10 : vector<8x1x128xf32> to vector<8x128xf32>
    %12 = vector.shape_cast %9 : vector<8x128xf32> to vector<8x1x128xf32>
    tpu.vector_store %arg4[%c0_7, %c0_8, %c0_9], %12 {strides = array<i32>} : memref<8x8x128xf32, #tpu.memory_space<vmem>>, vector<8x1x128xf32>,
    %c0_10 = arith.constant 0 : index
    %c1 = arith.constant 1 : index
    %c0_11 = arith.constant 0 : index
    %13 = vector.load %arg2[%c0_10, %c1, %c0_11] : memref<8x8x128xf32, #tpu.memory_space<vmem>>, vector<8x1x128xf32>
    %14 = vector.shape_cast %13 : vector<8x1x128xf32> to vector<8x128xf32>
    %c0_12 = arith.constant 0 : index
    %c0_13 = arith.constant 0 : index
    %15 = vector.load %arg3[%c0_12, %c0_13] : memref<128x128xf32, #tpu.memory_space<vmem>>, vector<128x128xf32>
    %cst_14 = arith.constant dense<0.000000e+00> : vector<8x128xf32>
    %16 = tpu.matmul %9, %15, %cst_14 {dimension_numbers = #tpu.dot_dimension_numbers<[1], [0], [0], [1], [0, 0, 1, 1], [], []>} : vector<8x128xf32>, vector<128x128xf32>, vector<8x128xf32> -> vector<8x128xf32>
    %17 = arith.addf %14, %16 : vector<8x128xf32>
    %18 = math.tanh %17 : vector<8x128xf32>
    %c0_15 = arith.constant 0 : index
    %c1_16 = arith.constant 1 : index
    %c0_17 = arith.constant 0 : index
    %19 = vector.load %arg4[%c0_15, %c1_16, %c0_17] : memref<8x8x128xf32, #tpu.memory_space<vmem>>, vector<8x1x128xf32>
    %20 = vector.shape_cast %19 : vector<8x1x128xf32> to vector<8x128xf32>
    %21 = vector.shape_cast %18 : vector<8x128xf32> to vector<8x1x128xf32>
    tpu.vector_store %arg4[%c0_15, %c1_16, %c0_17], %21 {strides = array<i32>} : memref<8x8x128xf32, #tpu.memory_space<vmem>>, vector<8x1x128xf32>,
    %c0_18 = arith.constant 0 : index
    %c2 = arith.constant 2 : index
    %c0_19 = arith.constant 0 : index
    %22 = vector.load %arg2[%c0_18, %c2, %c0_19] : memref<8x8x128xf32, #tpu.memory_space<vmem>>, vector<8x1x128xf32>
    %23 = vector.shape_cast %22 : vector<8x1x128xf32> to vector<8x128xf32>
    %c0_20 = arith.constant 0 : index
    %c0_21 = arith.constant 0 : index
    %24 = vector.load %arg3[%c0_20, %c0_21] : memref<128x128xf32, #tpu.memory_space<vmem>>, vector<128x128xf32>
    %cst_22 = arith.constant dense<0.000000e+00> : vector<8x128xf32>
    %25 = tpu.matmul %18, %24, %cst_22 {dimension_numbers = #tpu.dot_dimension_numbers<[1], [0], [0], [1], [0, 0, 1, 1], [], []>} : vector<8x128xf32>, vector<128x128xf32>, vector<8x128xf32> -> vector<8x128xf32>
    %26 = arith.addf %23, %25 : vector<8x128xf32>
    %27 = math.tanh %26 : vector<8x128xf32>
    %c0_23 = arith.constant 0 : index
    %c2_24 = arith.constant 2 : index
    %c0_25 = arith.constant 0 : index
    %28 = vector.load %arg4[%c0_23, %c2_24, %c0_25] : memref<8x8x128xf32, #tpu.memory_space<vmem>>, vector<8x1x128xf32>
    %29 = vector.shape_cast %28 : vector<8x1x128xf32> to vector<8x128xf32>
    %30 = vector.shape_cast %27 : vector<8x128xf32> to vector<8x1x128xf32>
    tpu.vector_store %arg4[%c0_23, %c2_24, %c0_25], %30 {strides = array<i32>} : memref<8x8x128xf32, #tpu.memory_space<vmem>>, vector<8x1x128xf32>,
    %c0_26 = arith.constant 0 : index
    %c3 = arith.constant 3 : index
    %c0_27 = arith.constant 0 : index
    %31 = vector.load %arg2[%c0_26, %c3, %c0_27] : memref<8x8x128xf32, #tpu.memory_space<vmem>>, vector<8x1x128xf32>
    %32 = vector.shape_cast %31 : vector<8x1x128xf32> to vector<8x128xf32>
    %c0_28 = arith.constant 0 : index
    %c0_29 = arith.constant 0 : index
    %33 = vector.load %arg3[%c0_28, %c0_29] : memref<128x128xf32, #tpu.memory_space<vmem>>, vector<128x128xf32>
    %cst_30 = arith.constant dense<0.000000e+00> : vector<8x128xf32>
    %34 = tpu.matmul %27, %33, %cst_30 {dimension_numbers = #tpu.dot_dimension_numbers<[1], [0], [0], [1], [0, 0, 1, 1], [], []>} : vector<8x128xf32>, vector<128x128xf32>, vector<8x128xf32> -> vector<8x128xf32>
    %35 = arith.addf %32, %34 : vector<8x128xf32>
    %36 = math.tanh %35 : vector<8x128xf32>
    %c0_31 = arith.constant 0 : index
    %c3_32 = arith.constant 3 : index
    %c0_33 = arith.constant 0 : index
    %37 = vector.load %arg4[%c0_31, %c3_32, %c0_33] : memref<8x8x128xf32, #tpu.memory_space<vmem>>, vector<8x1x128xf32>
    %38 = vector.shape_cast %37 : vector<8x1x128xf32> to vector<8x128xf32>
    %39 = vector.shape_cast %36 : vector<8x128xf32> to vector<8x1x128xf32>
    tpu.vector_store %arg4[%c0_31, %c3_32, %c0_33], %39 {strides = array<i32>} : memref<8x8x128xf32, #tpu.memory_space<vmem>>, vector<8x1x128xf32>,
    %c0_34 = arith.constant 0 : index
    %c4 = arith.constant 4 : index
    %c0_35 = arith.constant 0 : index
    %40 = vector.load %arg2[%c0_34, %c4, %c0_35] : memref<8x8x128xf32, #tpu.memory_space<vmem>>, vector<8x1x128xf32>
    %41 = vector.shape_cast %40 : vector<8x1x128xf32> to vector<8x128xf32>
    %c0_36 = arith.constant 0 : index
    %c0_37 = arith.constant 0 : index
    %42 = vector.load %arg3[%c0_36, %c0_37] : memref<128x128xf32, #tpu.memory_space<vmem>>, vector<128x128xf32>
    %cst_38 = arith.constant dense<0.000000e+00> : vector<8x128xf32>
    %43 = tpu.matmul %36, %42, %cst_38 {dimension_numbers = #tpu.dot_dimension_numbers<[1], [0], [0], [1], [0, 0, 1, 1], [], []>} : vector<8x128xf32>, vector<128x128xf32>, vector<8x128xf32> -> vector<8x128xf32>
    %44 = arith.addf %41, %43 : vector<8x128xf32>
    %45 = math.tanh %44 : vector<8x128xf32>
    %c0_39 = arith.constant 0 : index
    %c4_40 = arith.constant 4 : index
    %c0_41 = arith.constant 0 : index
    %46 = vector.load %arg4[%c0_39, %c4_40, %c0_41] : memref<8x8x128xf32, #tpu.memory_space<vmem>>, vector<8x1x128xf32>
    %47 = vector.shape_cast %46 : vector<8x1x128xf32> to vector<8x128xf32>
    %48 = vector.shape_cast %45 : vector<8x128xf32> to vector<8x1x128xf32>
    tpu.vector_store %arg4[%c0_39, %c4_40, %c0_41], %48 {strides = array<i32>} : memref<8x8x128xf32, #tpu.memory_space<vmem>>, vector<8x1x128xf32>,
    %c0_42 = arith.constant 0 : index
    %c5 = arith.constant 5 : index
    %c0_43 = arith.constant 0 : index
    %49 = vector.load %arg2[%c0_42, %c5, %c0_43] : memref<8x8x128xf32, #tpu.memory_space<vmem>>, vector<8x1x128xf32>
    %50 = vector.shape_cast %49 : vector<8x1x128xf32> to vector<8x128xf32>
    %c0_44 = arith.constant 0 : index
    %c0_45 = arith.constant 0 : index
    %51 = vector.load %arg3[%c0_44, %c0_45] : memref<128x128xf32, #tpu.memory_space<vmem>>, vector<128x128xf32>
    %cst_46 = arith.constant dense<0.000000e+00> : vector<8x128xf32>
    %52 = tpu.matmul %45, %51, %cst_46 {dimension_numbers = #tpu.dot_dimension_numbers<[1], [0], [0], [1], [0, 0, 1, 1], [], []>} : vector<8x128xf32>, vector<128x128xf32>, vector<8x128xf32> -> vector<8x128xf32>
    %53 = arith.addf %50, %52 : vector<8x128xf32>
    %54 = math.tanh %53 : vector<8x128xf32>
    %c0_47 = arith.constant 0 : index
    %c5_48 = arith.constant 5 : index
    %c0_49 = arith.constant 0 : index
    %55 = vector.load %arg4[%c0_47, %c5_48, %c0_49] : memref<8x8x128xf32, #tpu.memory_space<vmem>>, vector<8x1x128xf32>
    %56 = vector.shape_cast %55 : vector<8x1x128xf32> to vector<8x128xf32>
    %57 = vector.shape_cast %54 : vector<8x128xf32> to vector<8x1x128xf32>
    tpu.vector_store %arg4[%c0_47, %c5_48, %c0_49], %57 {strides = array<i32>} : memref<8x8x128xf32, #tpu.memory_space<vmem>>, vector<8x1x128xf32>,
    %c0_50 = arith.constant 0 : index
    %c6 = arith.constant 6 : index
    %c0_51 = arith.constant 0 : index
    %58 = vector.load %arg2[%c0_50, %c6, %c0_51] : memref<8x8x128xf32, #tpu.memory_space<vmem>>, vector<8x1x128xf32>
    %59 = vector.shape_cast %58 : vector<8x1x128xf32> to vector<8x128xf32>
    %c0_52 = arith.constant 0 : index
    %c0_53 = arith.constant 0 : index
    %60 = vector.load %arg3[%c0_52, %c0_53] : memref<128x128xf32, #tpu.memory_space<vmem>>, vector<128x128xf32>
    %cst_54 = arith.constant dense<0.000000e+00> : vector<8x128xf32>
    %61 = tpu.matmul %54, %60, %cst_54 {dimension_numbers = #tpu.dot_dimension_numbers<[1], [0], [0], [1], [0, 0, 1, 1], [], []>} : vector<8x128xf32>, vector<128x128xf32>, vector<8x128xf32> -> vector<8x128xf32>
    %62 = arith.addf %59, %61 : vector<8x128xf32>
    %63 = math.tanh %62 : vector<8x128xf32>
    %c0_55 = arith.constant 0 : index
    %c6_56 = arith.constant 6 : index
    %c0_57 = arith.constant 0 : index
    %64 = vector.load %arg4[%c0_55, %c6_56, %c0_57] : memref<8x8x128xf32, #tpu.memory_space<vmem>>, vector<8x1x128xf32>
    %65 = vector.shape_cast %64 : vector<8x1x128xf32> to vector<8x128xf32>
    %66 = vector.shape_cast %63 : vector<8x128xf32> to vector<8x1x128xf32>
    tpu.vector_store %arg4[%c0_55, %c6_56, %c0_57], %66 {strides = array<i32>} : memref<8x8x128xf32, #tpu.memory_space<vmem>>, vector<8x1x128xf32>,
    %c0_58 = arith.constant 0 : index
    %c7 = arith.constant 7 : index
    %c0_59 = arith.constant 0 : index
    %67 = vector.load %arg2[%c0_58, %c7, %c0_59] : memref<8x8x128xf32, #tpu.memory_space<vmem>>, vector<8x1x128xf32>
    %68 = vector.shape_cast %67 : vector<8x1x128xf32> to vector<8x128xf32>
    %c0_60 = arith.constant 0 : index
    %c0_61 = arith.constant 0 : index
    %69 = vector.load %arg3[%c0_60, %c0_61] : memref<128x128xf32, #tpu.memory_space<vmem>>, vector<128x128xf32>
    %cst_62 = arith.constant dense<0.000000e+00> : vector<8x128xf32>
    %70 = tpu.matmul %63, %69, %cst_62 {dimension_numbers = #tpu.dot_dimension_numbers<[1], [0], [0], [1], [0, 0, 1, 1], [], []>} : vector<8x128xf32>, vector<128x128xf32>, vector<8x128xf32> -> vector<8x128xf32>
    %71 = arith.addf %68, %70 : vector<8x128xf32>
    %72 = math.tanh %71 : vector<8x128xf32>
    %c0_63 = arith.constant 0 : index
    %c7_64 = arith.constant 7 : index
    %c0_65 = arith.constant 0 : index
    %73 = vector.load %arg4[%c0_63, %c7_64, %c0_65] : memref<8x8x128xf32, #tpu.memory_space<vmem>>, vector<8x1x128xf32>
    %74 = vector.shape_cast %73 : vector<8x1x128xf32> to vector<8x128xf32>
    %75 = vector.shape_cast %72 : vector<8x128xf32> to vector<8x1x128xf32>
    tpu.vector_store %arg4[%c0_63, %c7_64, %c0_65], %75 {strides = array<i32>} : memref<8x8x128xf32, #tpu.memory_space<vmem>>, vector<8x1x128xf32>,
    %c0_66 = arith.constant 0 : index
    %c0_67 = arith.constant 0 : index
    %76 = vector.load %arg5[%c0_66, %c0_67] : memref<8x128xf32, #tpu.memory_space<vmem>>, vector<8x128xf32>
    tpu.vector_store %arg5[%c0_66, %c0_67], %72 {strides = array<i32>} : memref<8x128xf32, #tpu.memory_space<vmem>>, vector<8x128xf32>,
    return
  }
  func.func @transform_0(%arg0: i32, %arg1: i32) -> (i32, i32, i32) {
    %c0_i32 = arith.constant 0 : i32
    %c0_i32_0 = arith.constant 0 : i32
    return %arg0, %arg1, %c0_i32 : i32, i32, i32
  }
  func.func @transform_1(%arg0: i32, %arg1: i32) -> (i32, i32) {
    %c0_i32 = arith.constant 0 : i32
    %c0_i32_0 = arith.constant 0 : i32
    %c0_i32_1 = arith.constant 0 : i32
    return %c0_i32, %c0_i32_0 : i32, i32
  }
  func.func @transform_2(%arg0: i32, %arg1: i32) -> (i32, i32, i32) {
    %c0_i32 = arith.constant 0 : i32
    %c0_i32_0 = arith.constant 0 : i32
    return %arg0, %arg1, %c0_i32 : i32, i32, i32
  }
}

</mosaic_0001>

<bundles_post_ra>
// kernel: tpu_custom_call.1
= control target key start
LH: loop header
LB: loop body
LE: loop exit
PB: predicated region body
PF: predicated region fallthrough
CT: control target
= control target key end

     0   :  { %7 = vsyncpa [#allocation4], 0  ;;  %s2414_s0 = inlined_call_operand.hbm [shape: f32[8,8,128], index: 0, kind: input, shape index: {}]   ;;  %s2415_s1 = inlined_call_operand.hbm [shape: f32[128,128], index: 1, kind: input, shape index: {}]   ;;  %s2416_s2 = inlined_call_operand.hbm [shape: f32[8,8,128], index: 2, kind: output, shape index: {}]  }
   0x1   :  { %8 = vsyncpa [#allocation7], 0 }
   0x2   :  { %9 = vsyncpa [#allocation5], 0  ;;  %s2144_s9 = smov [#allocation3]   ;;  %s2072_s13 = scalar_lea.hbm %s2414_s0, 1024 }
   0x3   :  { %s15_s10 = sshll.u32 %s2144_s9, 4  ;;  %p2073_p0 = scmp.ne.s32.totalorder %s2414_s0, %s2072_s13  ;;  %s16_s10 = int_to_ptr.vmem [resolvable:$true] %s15_s10 }
   0x4   :  { %p2076_p1 = scmp.lt.u32.totalorder %s2072_s13, %s2414_s0 }
   0x6   :  { %p2078_p2 = pnand %p2076_p1, %p2073_p0 }
   0x8   :  { %2081 = shalt.err (!%p2078_p2)
}
   0x9   :  { %s2082_s18 = scalar_lea.vmem %s16_s10, 1024  ;;  %p2087_p4 = scmp.lt.s32.totalorder %s16_s10, %s16_s10 }
   0xa   :  { %p2083_p3 = scmp.ne.s32.totalorder %s16_s10, %s2082_s18  ;;  %p2088_p5 = scmp.lt.s32.totalorder %s2082_s18, %s2082_s18 }
   0xc   :  { %p2089_p6 = por %p2088_p5, %p2087_p4 }
   0xe   :  { %p2090_p7 = pnand %p2089_p6, %p2083_p3 }
  0x10   :  { %2093 = shalt.err (!%p2090_p7)
}
  0x11   :  { %s2145_s19 = smov 128   ;;  %s2146_s20 = smov 8  }
  0x12   :  { %21 = dma.hbm_to_vmem [thread:$0]  %s2414_s0, 1024, %s16_s10, [#allocation4], %s2145_s19, %s2145_s19, %s2146_s20  }
  0x13   :  { %s2147_s23 = smov [#allocation6]   ;;  %s2094_s27 = scalar_lea.hbm %s2415_s1, 2048 }
  0x14   :  { %s27_s24 = sshll.u32 %s2147_s23, 4  ;;  %p2095_p8 = scmp.ne.s32.totalorder %s2415_s1, %s2094_s27  ;;  %s28_s24 = int_to_ptr.vmem [resolvable:$true] %s27_s24 }
  0x15   :  { %p2098_p9 = scmp.lt.u32.totalorder %s2094_s27, %s2415_s1 }
  0x17   :  { %p2100_p10 = pnand %p2098_p9, %p2095_p8 }
  0x19   :  { %2103 = shalt.err (!%p2100_p10)
}
  0x1a   :  { %s2104_s4 = scalar_lea.vmem %s28_s24, 2048  ;;  %p2109_p12 = scmp.lt.s32.totalorder %s28_s24, %s28_s24 }
  0x1b   :  { %p2105_p11 = scmp.ne.s32.totalorder %s28_s24, %s2104_s4  ;;  %p2110_p13 = scmp.lt.s32.totalorder %s2104_s4, %s2104_s4 }
  0x1d   :  { %p2111_p0 = por %p2110_p13, %p2109_p12 }
  0x1f   :  { %p2112_p1 = pnand %p2111_p0, %p2105_p11 }
  0x21   :  { %2115 = shalt.err (!%p2112_p1)
}
  0x22   :  { %33 = dma.hbm_to_vmem [thread:$0]  %s2415_s1, 2048, %s28_s24, [#allocation7], %s2145_s19, %s2145_s19, %s2146_s20  }
  0x23   :  { %2138 = dma.done.wait [#allocation4], 1024  }
  0x24   :  { %2139 = vsyncadd [#allocation4], 4294966272 }
  0x25   :  { %2140 = dma.done.wait [#allocation7], 2048  }
  0x26   :  { %2141 = vsyncadd [#allocation7], 4294965248  ;;  %v2148_v0 = vmov 0.0|0.0   ;;  %vm2149_vm0 = vmmov 0   ;;  %v2150_v1 = vmov 0.0   ;;  %v54_v2 = vld [vmem:[#allocation6] sm:$0xff] }
  0x27   :  { %1744 = vmatprep.subr.bf16.mxu0 %v2148_v0  ;;  %1496 = vmatprep.mubr.msk.f32.mxu0 %vm2149_vm0, %v2150_v1  ;;  %v55_v3 = vld [vmem:[#allocation6 + $0x8] sm:$0xff]  ;;  %v56_v4 = vld [vmem:[#allocation6 + $0x10] sm:$0xff]  ;;  %v57_v6 = vld [vmem:[#allocation6 + $0x18] sm:$0xff]  ;;  %vm213_vm1 = vcmask 1041409   ;;  %vm216_vm2 = vcmask 1042434   ;;  %vm219_vm3 = vcmask 1043459  }
  0x28   :  { %1768 = vmatprep.subr.bf16.mxu1 %v2148_v0  ;;  %1531 = vmatprep.mubr.msk.f32.mxu1 %vm2149_vm0, %v2150_v1  ;;  %v2203_v5 = vpack.c.bf16 %v55_v3, %v54_v2  ;;  %v2206_v7 = vpack.c.bf16 %v57_v6, %v56_v4  ;;  %v58_v8 = vld [vmem:[#allocation6 + $0x20] sm:$0xff]  ;;  %v59_v9 = vld [vmem:[#allocation6 + $0x28] sm:$0xff]  ;;  %v60_v11 = vld [vmem:[#allocation6 + $0x30] sm:$0xff]  ;;  %vm222_vm4 = vcmask 1044484   ;;  %vm225_vm5 = vcmask 1045509   ;;  %s2151_s1 = smov [#allocation8]  }
  0x29   :  { %v2212_v10 = vpack.c.bf16 %v59_v9, %v58_v8  ;;  %v61_v12 = vld [vmem:[#allocation6 + $0x38] sm:$0xff]  ;;  %v62_v14 = vld [vmem:[#allocation6 + $0x40] sm:$0xff]  ;;  %v63_v15 = vld [vmem:[#allocation6 + $0x48] sm:$0xff]  ;;  %vm228_vm6 = vcmask 1046534   ;;  %vm231_vm7 = vcmask 1047559   ;;  %s1315_s6 = sshll.u32 %s2151_s1, 4  ;;  %s1316_s6 = int_to_ptr.vmem [resolvable:$true] %s1315_s6 }
  0x2a   :  { %1746 = vmatpush3.bf16.msra.mxu0 %v2203_v5  ;;  %1770 = vmatpush3.bf16.msra.mxu1 %v2203_v5  ;;  %v2218_v13 = vpack.c.bf16 %v61_v12, %v60_v11  ;;  %v2224_v16 = vpack.c.bf16 %v63_v15, %v62_v14  ;;  %v64_v17 = vld [vmem:[#allocation6 + $0x50] sm:$0xff]  ;;  %v65_v18 = vld [vmem:[#allocation6 + $0x58] sm:$0xff]  ;;  %v66_v20 = vld [vmem:[#allocation6 + $0x60] sm:$0xff]  ;;  %s2116_s7 = scalar_lea.vmem %s1316_s6, 1024  ;;  %p2121_p3 = scmp.lt.s32.totalorder %s1316_s6, %s1316_s6 }
  0x2b   :  { %1747 = vmatprep.subr.bf16.mxu0 %v2148_v0  ;;  %1771 = vmatprep.subr.bf16.mxu1 %v2148_v0  ;;  %v2230_v19 = vpack.c.bf16 %v65_v18, %v64_v17  ;;  %v67_v21 = vld [vmem:[#allocation6 + $0x68] sm:$0xff]  ;;  %v68_v23 = vld [vmem:[#allocation6 + $0x70] sm:$0xff]  ;;  %v69_v24 = vld [vmem:[#allocation6 + $0x78] sm:$0xff]  ;;  %p2117_p2 = scmp.ne.s32.totalorder %s1316_s6, %s2116_s7  ;;  %p2122_p4 = scmp.lt.s32.totalorder %s2116_s7, %s2116_s7 }
  0x2c   :  { %v2236_v22 = vpack.c.bf16 %v67_v21, %v66_v20  ;;  %v2242_v25 = vpack.c.bf16 %v69_v24, %v68_v23  ;;  %v46_v26 = vld [vmem:[#allocation3] sm:$0x1]  ;;  %v47_v27 = vld [vmem:[#allocation3 + $0x8] sm:$0x1]  ;;  %v48_v28 = vld [vmem:[#allocation3 + $0x10] sm:$0x1] }
  0x2d   :  { %v49_v29 = vld [vmem:[#allocation3 + $0x18] sm:$0x1]  ;;  %v50_v30 = vld [vmem:[#allocation3 + $0x20] sm:$0x1]  ;;  %v51_v37 = vld [vmem:[#allocation3 + $0x28] sm:$0x1]  ;;  %p2123_p5 = por %p2122_p4, %p2121_p3 }
  0x2e   :  { %1749 = vmatpush3.bf16.msra.mxu0 %v2206_v7  ;;  %1773 = vmatpush3.bf16.msra.mxu1 %v2206_v7  ;;  %v52_v44 = vld [vmem:[#allocation3 + $0x30] sm:$0x1]  ;;  %v53_v47 = vld [vmem:[#allocation3 + $0x38] sm:$0x1]  ;;  %v180_v15 = vld [vmem:[#allocation3 + $0x1] sm:$0x1] }
  0x2f   :  { %1750 = vmatprep.subr.bf16.mxu0 %v2148_v0  ;;  %1774 = vmatprep.subr.bf16.mxu1 %v2148_v0  ;;  %v181_v17 = vld [vmem:[#allocation3 + $0x9] sm:$0x1]  ;;  %v182_v18 = vld [vmem:[#allocation3 + $0x11] sm:$0x1]  ;;  %v183_v20 = vld [vmem:[#allocation3 + $0x19] sm:$0x1]  ;;  %p2124_p6 = pnand %p2123_p5, %p2117_p2 }
  0x30   :  { %v184_v21 = vld [vmem:[#allocation3 + $0x21] sm:$0x1] }
  0x32   :  { %1752 = vmatpush3.bf16.msra.mxu0 %v2212_v10  ;;  %1776 = vmatpush3.bf16.msra.mxu1 %v2212_v10 }
  0x33   :  { %1753 = vmatprep.subr.bf16.mxu0 %v2148_v0  ;;  %1777 = vmatprep.subr.bf16.mxu1 %v2148_v0 }
  0x36   :  { %1755 = vmatpush3.bf16.msra.mxu0 %v2218_v13  ;;  %1779 = vmatpush3.bf16.msra.mxu1 %v2218_v13 }
  0x37   :  { %1756 = vmatprep.subr.bf16.mxu0 %v2148_v0  ;;  %1780 = vmatprep.subr.bf16.mxu1 %v2148_v0 }
  0x3a   :  { %1758 = vmatpush3.bf16.msra.mxu0 %v2224_v16  ;;  %1782 = vmatpush3.bf16.msra.mxu1 %v2224_v16 }
  0x3b   :  { %1759 = vmatprep.subr.bf16.mxu0 %v2148_v0  ;;  %1783 = vmatprep.subr.bf16.mxu1 %v2148_v0 }
  0x3e   :  { %1761 = vmatpush3.bf16.msra.mxu0 %v2230_v19  ;;  %1785 = vmatpush3.bf16.msra.mxu1 %v2230_v19 }
  0x3f   :  { %1762 = vmatprep.subr.bf16.mxu0 %v2148_v0  ;;  %1786 = vmatprep.subr.bf16.mxu1 %v2148_v0 }
  0x42   :  { %1764 = vmatpush3.bf16.msra.mxu0 %v2236_v22  ;;  %1788 = vmatpush3.bf16.msra.mxu1 %v2236_v22 }
  0x43   :  { %1765 = vmatprep.subr.bf16.mxu0 %v2148_v0  ;;  %1789 = vmatprep.subr.bf16.mxu1 %v2148_v0 }
  0x46   :  { %1767 = vmatpush3.bf16.msra.mxu0 %v2242_v25  ;;  %1791 = vmatpush3.bf16.msra.mxu1 %v2242_v25 }
  0x47   :  { %1792 = vmatprep.subr.bf16.mxu0 %v2148_v0  ;;  %1816 = vmatprep.subr.bf16.mxu1 %v2148_v0 }
  0x49   :  { %1497 = vmatmul.mubr.f32.vlgmr.msra.gmra.mrb[0].mxu0 %v2150_v1 }
  0x4a   :  { %1794 = vmatpush3.bf16.msra.mxu0 %v2203_v5  ;;  %1566 = vmatprep.mubr.msk.f32.mxu0 %vm2149_vm0, %v2150_v1 }
  0x4b   :  { %1795 = vmatprep.subr.bf16.mxu0 %v2148_v0 }
  0x4e   :  { %1797 = vmatpush3.bf16.msra.mxu0 %v2206_v7 }
  0x4f   :  { %1798 = vmatprep.subr.bf16.mxu0 %v2148_v0 }
  0x52   :  { %1800 = vmatpush3.bf16.msra.mxu0 %v2212_v10 }
  0x53   :  { %1801 = vmatprep.subr.bf16.mxu0 %v2148_v0 }
  0x56   :  { %1803 = vmatpush3.bf16.msra.mxu0 %v2218_v13 }
  0x57   :  { %1804 = vmatprep.subr.bf16.mxu0 %v2148_v0 }
  0x5a   :  { %1806 = vmatpush3.bf16.msra.mxu0 %v2224_v16 }
  0x5b   :  { %1807 = vmatprep.subr.bf16.mxu0 %v2148_v0 }
  0x5e   :  { %1809 = vmatpush3.bf16.msra.mxu0 %v2230_v19 }
  0x5f   :  { %1810 = vmatprep.subr.bf16.mxu0 %v2148_v0 }
  0x62   :  { %1812 = vmatpush3.bf16.msra.mxu0 %v2236_v22 }
  0x63   :  { %1813 = vmatprep.subr.bf16.mxu0 %v2148_v0 }
  0x66   :  { %1815 = vmatpush3.bf16.msra.mxu0 %v2242_v25 }
  0x67   :  { %1840 = vmatprep.subr.bf16.mxu0 %v2148_v0 }
 0x11c   :  { %v136_v31 = vpop.f32.mrb[0].mxu0 }
 0x11d   :  { %v141_v32 = vrot.slane %v136_v31, 1  ;;  %v142_v33 = vrot.slane %v136_v31, 2  ;;  %v143_v34 = vrot.slane %v136_v31, 3  ;;  %v144_v35 = vrot.slane %v136_v31, 4  ;;  %v1498_v36 = vpop.f32.mrb[1].mxu0 }
 0x11e   :  { %v145_v38 = vrot.slane %v136_v31, 5  ;;  %v146_v39 = vrot.slane %v136_v31, 6  ;;  %v156_v40 = vadd.f32 %v136_v31, %v46_v26  ;;  %v147_v45 = vrot.slane %v136_v31, 7 }
 0x11f   :  { %v157_v41 = vadd.f32 %v141_v32, %v47_v27  ;;  %v158_v42 = vadd.f32 %v142_v33, %v48_v28  ;;  %v159_v43 = vadd.f32 %v143_v34, %v49_v29  ;;  %v160_v46 = vadd.f32 %v144_v35, %v50_v30  ;;  %v185_v30 = vld [vmem:[#allocation3 + $0x29] sm:$0x1] }
 0x120   :  { %1944 = vtanh.f32 %v156_v40  ;;  %v161_v48 = vadd.f32 %v145_v38, %v51_v37  ;;  %v162_v49 = vadd.f32 %v146_v39, %v52_v44  ;;  %v163_v50 = vadd.f32 %v147_v45, %v53_v47  ;;  %v186_v38 = vld [vmem:[#allocation3 + $0x31] sm:$0x1]  ;;  %v187_v40 = vld [vmem:[#allocation3 + $0x39] sm:$0x1] }
 0x121   :  { %1946 = vtanh.f32 %v157_v41 }
 0x122   :  { %1948 = vtanh.f32 %v158_v42 }
 0x123   :  { %1950 = vtanh.f32 %v159_v43 }
 0x124   :  { %1952 = vtanh.f32 %v160_v46 }
 0x125   :  { %1954 = vtanh.f32 %v161_v48 }
 0x126   :  { %1956 = vtanh.f32 %v162_v49 }
 0x127   :  { %1958 = vtanh.f32 %v163_v50 }
 0x12a   :  { %v1945_v51 = vpop.eup %1944 }
 0x12b   :  { %v1947_v52 = vpop.eup %1946  ;;  %172 = vst [vmem:[#allocation8] sm:$0x1] %v1945_v51 }
 0x12c   :  { %v1949_v53 = vpop.eup %1948  ;;  %173 = vst [vmem:[#allocation8 + $0x8] sm:$0x1] %v1947_v52  ;;  %v212_v54 = vrot.slane %v1947_v52, 7 }
 0x12d   :  { %v1951_v55 = vpop.eup %1950  ;;  %174 = vst [vmem:[#allocation8 + $0x10] sm:$0x1] %v1949_v53  ;;  %v215_v56 = vrot.slane %v1949_v53, 6 }
 0x12e   :  { %v1953_v57 = vpop.eup %1952  ;;  %175 = vst [vmem:[#allocation8 + $0x18] sm:$0x1] %v1951_v55  ;;  %v214_v58 = vsel %vm213_vm1, %v212_v54, %v1945_v51  ;;  %v218_v59 = vrot.slane %v1951_v55, 5 }
 0x12f   :  { %v1955_v60 = vpop.eup %1954  ;;  %176 = vst [vmem:[#allocation8 + $0x20] sm:$0x1] %v1953_v57  ;;  %v217_v61 = vsel %vm216_vm2, %v215_v56, %v214_v58  ;;  %v221_v62 = vrot.slane %v1953_v57, 4 }
 0x130   :  { %v1957_v63 = vpop.eup %1956  ;;  %177 = vst [vmem:[#allocation8 + $0x28] sm:$0x1] %v1955_v60  ;;  %v220_v2 = vsel %vm219_vm3, %v218_v59, %v217_v61  ;;  %v224_v3 = vrot.slane %v1955_v60, 3 }
 0x131   :  { %v1959_v4 = vpop.eup %1958  ;;  %178 = vst [vmem:[#allocation8 + $0x30] sm:$0x1] %v1957_v63  ;;  %v223_v6 = vsel %vm222_vm4, %v221_v62, %v220_v2  ;;  %v227_v8 = vrot.slane %v1957_v63, 2 }
 0x132   :  { %179 = vst [vmem:[#allocation8 + $0x38] sm:$0x1] %v1959_v4  ;;  %v226_v9 = vsel %vm225_vm5, %v224_v3, %v223_v6  ;;  %v230_v11 = vrot.slane %v1959_v4, 1  ;;  %v344_v4 = vld [vmem:[#allocation3 + $0x2] sm:$0x1] }
 0x133   :  { %v229_v12 = vsel %vm228_vm6, %v227_v8, %v226_v9  ;;  %v345_v6 = vld [vmem:[#allocation3 + $0xa] sm:$0x1]  ;;  %v346_v8 = vld [vmem:[#allocation3 + $0x12] sm:$0x1]  ;;  %v347_v9 = vld [vmem:[#allocation3 + $0x1a] sm:$0x1] }
 0x134   :  { %v232_v14 = vsel %vm231_vm7, %v230_v11, %v229_v12  ;;  %v348_v11 = vld [vmem:[#allocation3 + $0x22] sm:$0x1] }
 0x135   :  { %1532 = vmatmul.mubr.f32.vlgmr.msra.gmra.mrb[0].mxu1 %v232_v14 }
 0x136   :  { %1818 = vmatpush3.bf16.msra.mxu1 %v2203_v5  ;;  %1601 = vmatprep.mubr.msk.f32.mxu1 %vm2149_vm0, %v2150_v1 }
 0x137   :  { %1819 = vmatprep.subr.bf16.mxu1 %v2148_v0 }
 0x13a   :  { %1821 = vmatpush3.bf16.msra.mxu1 %v2206_v7 }
 0x13b   :  { %1822 = vmatprep.subr.bf16.mxu1 %v2148_v0 }
 0x13e   :  { %1824 = vmatpush3.bf16.msra.mxu1 %v2212_v10 }
 0x13f   :  { %1825 = vmatprep.subr.bf16.mxu1 %v2148_v0 }
 0x142   :  { %1827 = vmatpush3.bf16.msra.mxu1 %v2218_v13 }
 0x143   :  { %1828 = vmatprep.subr.bf16.mxu1 %v2148_v0 }
 0x146   :  { %1830 = vmatpush3.bf16.msra.mxu1 %v2224_v16 }
 0x147   :  { %1831 = vmatprep.subr.bf16.mxu1 %v2148_v0 }
 0x14a   :  { %1833 = vmatpush3.bf16.msra.mxu1 %v2230_v19 }
 0x14b   :  { %1834 = vmatprep.subr.bf16.mxu1 %v2148_v0 }
 0x14e   :  { %1836 = vmatpush3.bf16.msra.mxu1 %v2236_v22 }
 0x14f   :  { %1837 = vmatprep.subr.bf16.mxu1 %v2148_v0 }
 0x152   :  { %1839 = vmatpush3.bf16.msra.mxu1 %v2242_v25 }
 0x153   :  { %1864 = vmatprep.subr.bf16.mxu1 %v2148_v0 }
 0x208   :  { %v300_v23 = vpop.f32.mrb[0].mxu1 }
 0x209   :  { %v305_v24 = vrot.slane %v300_v23, 1  ;;  %v306_v26 = vrot.slane %v300_v23, 2  ;;  %v307_v27 = vrot.slane %v300_v23, 3  ;;  %v308_v28 = vrot.slane %v300_v23, 4  ;;  %v1533_v29 = vpop.f32.mrb[1].mxu1 }
 0x20a   :  { %v309_v31 = vrot.slane %v300_v23, 5  ;;  %v310_v32 = vrot.slane %v300_v23, 6  ;;  %v320_v33 = vadd.f32 %v300_v23, %v180_v15  ;;  %v311_v34 = vrot.slane %v300_v23, 7 }
 0x20b   :  { %v321_v35 = vadd.f32 %v305_v24, %v181_v17  ;;  %v322_v36 = vadd.f32 %v306_v26, %v182_v18  ;;  %v323_v37 = vadd.f32 %v307_v27, %v183_v20  ;;  %v324_v39 = vadd.f32 %v308_v28, %v184_v21  ;;  %v349_v21 = vld [vmem:[#allocation3 + $0x2a] sm:$0x1] }
 0x20c   :  { %1960 = vtanh.f32 %v320_v33  ;;  %v325_v41 = vadd.f32 %v309_v31, %v185_v30  ;;  %v326_v42 = vadd.f32 %v310_v32, %v186_v38  ;;  %v327_v43 = vadd.f32 %v311_v34, %v187_v40  ;;  %v350_v31 = vld [vmem:[#allocation3 + $0x32] sm:$0x1]  ;;  %v351_v33 = vld [vmem:[#allocation3 + $0x3a] sm:$0x1] }
 0x20d   :  { %1962 = vtanh.f32 %v321_v35 }
 0x20e   :  { %1964 = vtanh.f32 %v322_v36 }
 0x20f   :  { %1966 = vtanh.f32 %v323_v37 }
 0x210   :  { %1968 = vtanh.f32 %v324_v39 }
 0x211   :  { %1970 = vtanh.f32 %v325_v41 }
 0x212   :  { %1972 = vtanh.f32 %v326_v42 }
 0x213   :  { %1974 = vtanh.f32 %v327_v43 }
 0x216   :  { %v1961_v44 = vpop.eup %1960 }
 0x217   :  { %v1963_v45 = vpop.eup %1962  ;;  %336 = vst [vmem:[#allocation8 + $0x1] sm:$0x1] %v1961_v44 }
 0x218   :  { %v1965_v46 = vpop.eup %1964  ;;  %337 = vst [vmem:[#allocation8 + $0x9] sm:$0x1] %v1963_v45  ;;  %v376_v47 = vrot.slane %v1963_v45, 7 }
 0x219   :  { %v1967_v48 = vpop.eup %1966  ;;  %338 = vst [vmem:[#allocation8 + $0x11] sm:$0x1] %v1965_v46  ;;  %v378_v49 = vrot.slane %v1965_v46, 6 }
 0x21a   :  { %v1969_v50 = vpop.eup %1968  ;;  %339 = vst [vmem:[#allocation8 + $0x19] sm:$0x1] %v1967_v48  ;;  %v377_v51 = vsel %vm213_vm1, %v376_v47, %v1961_v44  ;;  %v380_v52 = vrot.slane %v1967_v48, 5 }
 0x21b   :  { %v1971_v53 = vpop.eup %1970  ;;  %340 = vst [vmem:[#allocation8 + $0x21] sm:$0x1] %v1969_v50  ;;  %v379_v54 = vsel %vm216_vm2, %v378_v49, %v377_v51  ;;  %v382_v55 = vrot.slane %v1969_v50, 4 }
 0x21c   :  { %v1973_v56 = vpop.eup %1972  ;;  %341 = vst [vmem:[#allocation8 + $0x29] sm:$0x1] %v1971_v53  ;;  %v381_v57 = vsel %vm219_vm3, %v380_v52, %v379_v54  ;;  %v384_v58 = vrot.slane %v1971_v53, 3 }
 0x21d   :  { %v1975_v59 = vpop.eup %1974  ;;  %342 = vst [vmem:[#allocation8 + $0x31] sm:$0x1] %v1973_v56  ;;  %v383_v60 = vsel %vm222_vm4, %v382_v55, %v381_v57  ;;  %v386_v61 = vrot.slane %v1973_v56, 2 }
 0x21e   :  { %343 = vst [vmem:[#allocation8 + $0x39] sm:$0x1] %v1975_v59  ;;  %v385_v62 = vsel %vm225_vm5, %v384_v58, %v383_v60  ;;  %v388_v63 = vrot.slane %v1975_v59, 1  ;;  %v505_v59 = vld [vmem:[#allocation3 + $0x23] sm:$0x1] }
 0x21f   :  { %v387_v2 = vsel %vm228_vm6, %v386_v61, %v385_v62 }
 0x220   :  { %v389_v3 = vsel %vm231_vm7, %v388_v63, %v387_v2  ;;  %v506_v2 = vld [vmem:[#allocation3 + $0x2b] sm:$0x1] }
 0x221   :  { %1567 = vmatmul.mubr.f32.vlgmr.msra.gmra.mrb[2].mxu0 %v389_v3 }
 0x222   :  { %1842 = vmatpush3.bf16.msra.mxu0 %v2203_v5  ;;  %1636 = vmatprep.mubr.msk.f32.mxu0 %vm2149_vm0, %v2150_v1 }
 0x223   :  { %1843 = vmatprep.subr.bf16.mxu0 %v2148_v0 }
 0x226   :  { %1845 = vmatpush3.bf16.msra.mxu0 %v2206_v7 }
 0x227   :  { %1846 = vmatprep.subr.bf16.mxu0 %v2148_v0 }
 0x22a   :  { %1848 = vmatpush3.bf16.msra.mxu0 %v2212_v10 }
 0x22b   :  { %1849 = vmatprep.subr.bf16.mxu0 %v2148_v0 }
 0x22e   :  { %1851 = vmatpush3.bf16.msra.mxu0 %v2218_v13 }
 0x22f   :  { %1852 = vmatprep.subr.bf16.mxu0 %v2148_v0 }
 0x232   :  { %1854 = vmatpush3.bf16.msra.mxu0 %v2224_v16 }
 0x233   :  { %1855 = vmatprep.subr.bf16.mxu0 %v2148_v0 }
 0x236   :  { %1857 = vmatpush3.bf16.msra.mxu0 %v2230_v19 }
 0x237   :  { %1858 = vmatprep.subr.bf16.mxu0 %v2148_v0 }
 0x23a   :  { %1860 = vmatpush3.bf16.msra.mxu0 %v2236_v22 }
 0x23b   :  { %1861 = vmatprep.subr.bf16.mxu0 %v2148_v0 }
 0x23e   :  { %1863 = vmatpush3.bf16.msra.mxu0 %v2242_v25 }
 0x23f   :  { %1888 = vmatprep.subr.bf16.mxu0 %v2148_v0 }
 0x2f4   :  { %v457_v12 = vpop.f32.mrb[2].mxu0 }
 0x2f5   :  { %v462_v14 = vrot.slane %v457_v12, 1  ;;  %v463_v15 = vrot.slane %v457_v12, 2  ;;  %v464_v17 = vrot.slane %v457_v12, 3  ;;  %v465_v18 = vrot.slane %v457_v12, 4  ;;  %v1568_v20 = vpop.f32.mrb[3].mxu0 }
 0x2f6   :  { %v466_v23 = vrot.slane %v457_v12, 5  ;;  %v467_v24 = vrot.slane %v457_v12, 6  ;;  %v477_v26 = vadd.f32 %v457_v12, %v344_v4  ;;  %v468_v27 = vrot.slane %v457_v12, 7 }
 0x2f7   :  { %v478_v28 = vadd.f32 %v462_v14, %v345_v6  ;;  %v479_v29 = vadd.f32 %v463_v15, %v346_v8  ;;  %v480_v30 = vadd.f32 %v464_v17, %v347_v9  ;;  %v481_v32 = vadd.f32 %v465_v18, %v348_v11  ;;  %v507_v11 = vld [vmem:[#allocation3 + $0x33] sm:$0x1]  ;;  %v508_v14 = vld [vmem:[#allocation3 + $0x3b] sm:$0x1] }
 0x2f8   :  { %1976 = vtanh.f32 %v477_v26  ;;  %v482_v34 = vadd.f32 %v466_v23, %v349_v21  ;;  %v483_v35 = vadd.f32 %v467_v24, %v350_v31  ;;  %v484_v36 = vadd.f32 %v468_v27, %v351_v33 }
 0x2f9   :  { %1978 = vtanh.f32 %v478_v28 }
 0x2fa   :  { %1980 = vtanh.f32 %v479_v29 }
 0x2fb   :  { %1982 = vtanh.f32 %v480_v30 }
 0x2fc   :  { %1984 = vtanh.f32 %v481_v32 }
 0x2fd   :  { %1986 = vtanh.f32 %v482_v34 }
 0x2fe   :  { %1988 = vtanh.f32 %v483_v35 }
 0x2ff   :  { %1990 = vtanh.f32 %v484_v36 }
 0x302   :  { %v1977_v37 = vpop.eup %1976 }
 0x303   :  { %v1979_v38 = vpop.eup %1978  ;;  %493 = vst [vmem:[#allocation8 + $0x2] sm:$0x1] %v1977_v37 }
 0x304   :  { %v1981_v39 = vpop.eup %1980  ;;  %494 = vst [vmem:[#allocation8 + $0xa] sm:$0x1] %v1979_v38  ;;  %v533_v40 = vrot.slane %v1979_v38, 7 }
 0x305   :  { %v1983_v41 = vpop.eup %1982  ;;  %495 = vst [vmem:[#allocation8 + $0x12] sm:$0x1] %v1981_v39  ;;  %v535_v42 = vrot.slane %v1981_v39, 6 }
 0x306   :  { %v1985_v43 = vpop.eup %1984  ;;  %496 = vst [vmem:[#allocation8 + $0x1a] sm:$0x1] %v1983_v41  ;;  %v534_v44 = vsel %vm213_vm1, %v533_v40, %v1977_v37  ;;  %v537_v45 = vrot.slane %v1983_v41, 5 }
 0x307   :  { %v1987_v46 = vpop.eup %1986  ;;  %497 = vst [vmem:[#allocation8 + $0x22] sm:$0x1] %v1985_v43  ;;  %v536_v47 = vsel %vm216_vm2, %v535_v42, %v534_v44  ;;  %v539_v48 = vrot.slane %v1985_v43, 4  ;;  %v980_v44 = vld [vmem:[#allocation6] sm:$0xff] }
 0x308   :  { %v1989_v49 = vpop.eup %1988  ;;  %498 = vst [vmem:[#allocation8 + $0x2a] sm:$0x1] %v1987_v46  ;;  %v538_v50 = vsel %vm219_vm3, %v537_v45, %v536_v47  ;;  %v541_v51 = vrot.slane %v1987_v46, 3  ;;  %v981_v45 = vld [vmem:[#allocation6 + $0x8] sm:$0xff]  ;;  %v982_v46 = vld [vmem:[#allocation6 + $0x10] sm:$0xff] }
 0x309   :  { %v1991_v52 = vpop.eup %1990  ;;  %499 = vst [vmem:[#allocation8 + $0x32] sm:$0x1] %v1989_v49  ;;  %v540_v53 = vsel %vm222_vm4, %v539_v48, %v538_v50  ;;  %v543_v54 = vrot.slane %v1989_v49, 2  ;;  %v2354_v47 = vpack.c.bf16 %v981_v45, %v980_v44  ;;  %v983_v48 = vld [vmem:[#allocation6 + $0x18] sm:$0xff]  ;;  %v658_v50 = vld [vmem:[#allocation3 + $0x4] sm:$0x1] }
 0x30a   :  { %500 = vst [vmem:[#allocation8 + $0x3a] sm:$0x1] %v1991_v52  ;;  %v542_v55 = vsel %vm225_vm5, %v541_v51, %v540_v53  ;;  %v545_v56 = vrot.slane %v1991_v52, 1  ;;  %v2357_v49 = vpack.c.bf16 %v983_v48, %v982_v46  ;;  %v659_v51 = vld [vmem:[#allocation3 + $0xc] sm:$0x1]  ;;  %v991_v44 = vld [vmem:[#allocation6 + $0x58] sm:$0xff] }
 0x30b   :  { %v544_v57 = vsel %vm228_vm6, %v543_v54, %v542_v55  ;;  %v660_v52 = vld [vmem:[#allocation3 + $0x14] sm:$0x1]  ;;  %v661_v53 = vld [vmem:[#allocation3 + $0x1c] sm:$0x1]  ;;  %v662_v54 = vld [vmem:[#allocation3 + $0x24] sm:$0x1] }
 0x30c   :  { %v546_v58 = vsel %vm231_vm7, %v545_v56, %v544_v57  ;;  %v992_v46 = vld [vmem:[#allocation6 + $0x60] sm:$0xff] }
 0x30d   :  { %1602 = vmatmul.mubr.f32.vlgmr.msra.gmra.mrb[2].mxu1 %v546_v58 }
 0x30e   :  { %1866 = vmatpush3.bf16.msra.mxu1 %v2203_v5  ;;  %1671 = vmatprep.mubr.msk.f32.mxu1 %vm2149_vm0, %v2150_v1  ;;  %v501_v5 = vld [vmem:[#allocation3 + $0x3] sm:$0x1] }
 0x30f   :  { %1867 = vmatprep.subr.bf16.mxu1 %v2148_v0 }
 0x312   :  { %1869 = vmatpush3.bf16.msra.mxu1 %v2206_v7  ;;  %v502_v7 = vld [vmem:[#allocation3 + $0xb] sm:$0x1] }
 0x313   :  { %1870 = vmatprep.subr.bf16.mxu1 %v2148_v0 }
 0x316   :  { %1872 = vmatpush3.bf16.msra.mxu1 %v2212_v10  ;;  %v503_v10 = vld [vmem:[#allocation3 + $0x13] sm:$0x1] }
 0x317   :  { %1873 = vmatprep.subr.bf16.mxu1 %v2148_v0 }
 0x31a   :  { %1875 = vmatpush3.bf16.msra.mxu1 %v2218_v13  ;;  %v504_v13 = vld [vmem:[#allocation3 + $0x1b] sm:$0x1] }
 0x31b   :  { %1876 = vmatprep.subr.bf16.mxu1 %v2148_v0 }
 0x31e   :  { %1878 = vmatpush3.bf16.msra.mxu1 %v2224_v16 }
 0x31f   :  { %1879 = vmatprep.subr.bf16.mxu1 %v2148_v0 }
 0x322   :  { %1881 = vmatpush3.bf16.msra.mxu1 %v2230_v19 }
 0x323   :  { %1882 = vmatprep.subr.bf16.mxu1 %v2148_v0 }
 0x326   :  { %1884 = vmatpush3.bf16.msra.mxu1 %v2236_v22 }
 0x327   :  { %1885 = vmatprep.subr.bf16.mxu1 %v2148_v0 }
 0x32a   :  { %1887 = vmatpush3.bf16.msra.mxu1 %v2242_v25 }
 0x32b   :  { %1912 = vmatprep.subr.bf16.mxu1 %v2148_v0 }
 0x3e0   :  { %v614_v16 = vpop.f32.mrb[2].mxu1 }
 0x3e1   :  { %v619_v60 = vrot.slane %v614_v16, 1  ;;  %v620_v61 = vrot.slane %v614_v16, 2  ;;  %v621_v62 = vrot.slane %v614_v16, 3  ;;  %v622_v19 = vrot.slane %v614_v16, 4  ;;  %v1603_v63 = vpop.f32.mrb[3].mxu1 }
 0x3e2   :  { %v623_v3 = vrot.slane %v614_v16, 5  ;;  %v624_v22 = vrot.slane %v614_v16, 6  ;;  %v634_v4 = vadd.f32 %v614_v16, %v501_v5  ;;  %v625_v6 = vrot.slane %v614_v16, 7  ;;  %v664_v63 = vld [vmem:[#allocation3 + $0x34] sm:$0x1] }
 0x3e3   :  { %v635_v8 = vadd.f32 %v619_v60, %v502_v7  ;;  %v636_v25 = vadd.f32 %v620_v61, %v503_v10  ;;  %v637_v9 = vadd.f32 %v621_v62, %v504_v13  ;;  %v638_v12 = vadd.f32 %v622_v19, %v505_v59  ;;  %v663_v10 = vld [vmem:[#allocation3 + $0x2c] sm:$0x1] }
 0x3e4   :  { %1992 = vtanh.f32 %v634_v4  ;;  %v639_v15 = vadd.f32 %v623_v3, %v506_v2  ;;  %v640_v17 = vadd.f32 %v624_v22, %v507_v11  ;;  %v641_v18 = vadd.f32 %v625_v6, %v508_v14  ;;  %v665_v3 = vld [vmem:[#allocation3 + $0x3c] sm:$0x1] }
 0x3e5   :  { %1994 = vtanh.f32 %v635_v8 }
 0x3e6   :  { %1996 = vtanh.f32 %v636_v25 }
 0x3e7   :  { %1998 = vtanh.f32 %v637_v9 }
 0x3e8   :  { %2000 = vtanh.f32 %v638_v12 }
 0x3e9   :  { %2002 = vtanh.f32 %v639_v15 }
 0x3ea   :  { %2004 = vtanh.f32 %v640_v17 }
 0x3eb   :  { %2006 = vtanh.f32 %v641_v18 }
 0x3ee   :  { %v1993_v20 = vpop.eup %1992 }
 0x3ef   :  { %v1995_v21 = vpop.eup %1994  ;;  %650 = vst [vmem:[#allocation8 + $0x3] sm:$0x1] %v1993_v20 }
 0x3f0   :  { %v1997_v23 = vpop.eup %1996  ;;  %651 = vst [vmem:[#allocation8 + $0xb] sm:$0x1] %v1995_v21  ;;  %v690_v24 = vrot.slane %v1995_v21, 7 }
 0x3f1   :  { %v1999_v26 = vpop.eup %1998  ;;  %652 = vst [vmem:[#allocation8 + $0x13] sm:$0x1] %v1997_v23  ;;  %v692_v27 = vrot.slane %v1997_v23, 6 }
 0x3f2   :  { %v2001_v28 = vpop.eup %2000  ;;  %653 = vst [vmem:[#allocation8 + $0x1b] sm:$0x1] %v1999_v26  ;;  %v691_v29 = vsel %vm213_vm1, %v690_v24, %v1993_v20  ;;  %v694_v30 = vrot.slane %v1999_v26, 5 }
 0x3f3   :  { %v2003_v31 = vpop.eup %2002  ;;  %654 = vst [vmem:[#allocation8 + $0x23] sm:$0x1] %v2001_v28  ;;  %v693_v32 = vsel %vm216_vm2, %v692_v27, %v691_v29  ;;  %v696_v33 = vrot.slane %v2001_v28, 4 }
 0x3f4   :  { %v2005_v34 = vpop.eup %2004  ;;  %655 = vst [vmem:[#allocation8 + $0x2b] sm:$0x1] %v2003_v31  ;;  %v695_v35 = vsel %vm219_vm3, %v694_v30, %v693_v32  ;;  %v698_v36 = vrot.slane %v2003_v31, 3 }
 0x3f5   :  { %v2007_v37 = vpop.eup %2006  ;;  %656 = vst [vmem:[#allocation8 + $0x33] sm:$0x1] %v2005_v34  ;;  %v697_v38 = vsel %vm222_vm4, %v696_v33, %v695_v35  ;;  %v700_v39 = vrot.slane %v2005_v34, 2  ;;  %v984_v35 = vld [vmem:[#allocation6 + $0x20] sm:$0xff] }
 0x3f6   :  { %657 = vst [vmem:[#allocation8 + $0x3b] sm:$0x1] %v2007_v37  ;;  %v699_v40 = vsel %vm225_vm5, %v698_v36, %v697_v38  ;;  %v702_v41 = vrot.slane %v2007_v37, 1  ;;  %v985_v36 = vld [vmem:[#allocation6 + $0x28] sm:$0xff]  ;;  %v986_v38 = vld [vmem:[#allocation6 + $0x30] sm:$0xff] }
 0x3f7   :  { %v701_v42 = vsel %vm228_vm6, %v700_v39, %v699_v40  ;;  %v1895_v37 = vpack.c.bf16 %v985_v36, %v984_v35  ;;  %v987_v39 = vld [vmem:[#allocation6 + $0x38] sm:$0xff]  ;;  %v972_v36 = vld [vmem:[#allocation3 + $0x6] sm:$0x1] }
 0x3f8   :  { %v703_v43 = vsel %vm231_vm7, %v702_v41, %v701_v42  ;;  %v1898_v40 = vpack.c.bf16 %v987_v39, %v986_v38  ;;  %v989_v41 = vld [vmem:[#allocation6 + $0x48] sm:$0xff]  ;;  %v974_v38 = vld [vmem:[#allocation3 + $0x16] sm:$0x1]  ;;  %v975_v39 = vld [vmem:[#allocation3 + $0x1e] sm:$0x1] }
 0x3f9   :  { %1637 = vmatmul.mubr.f32.vlgmr.msra.gmra.mrb[4].mxu0 %v703_v43  ;;  %v990_v43 = vld [vmem:[#allocation6 + $0x50] sm:$0xff] }
 0x3fa   :  { %1706 = vmatprep.mubr.msk.f32.mxu0 %vm2149_vm0, %v2150_v1  ;;  %1890 = vmatpush3.bf16.msra.mxu0 %v2354_v47  ;;  %v1904_v45 = vpack.c.bf16 %v991_v44, %v990_v43 }
 0x3fb   :  { %1891 = vmatprep.subr.bf16.mxu0 %v2148_v0 }
 0x3fe   :  { %1893 = vmatpush3.bf16.msra.mxu0 %v2357_v49 }
 0x3ff   :  { %1894 = vmatprep.subr.bf16.mxu0 %v2148_v0 }
 0x402   :  { %1896 = vmatpush3.bf16.msra.mxu0 %v1895_v37 }
 0x403   :  { %1897 = vmatprep.subr.bf16.mxu0 %v2148_v0 }
 0x406   :  { %1899 = vmatpush3.bf16.msra.mxu0 %v1898_v40 }
 0x407   :  { %1900 = vmatprep.subr.bf16.mxu0 %v2148_v0 }
 0x4cc   :  { %v771_v55 = vpop.f32.mrb[4].mxu0 }
 0x4cd   :  { %v776_v56 = vrot.slane %v771_v55, 1  ;;  %v777_v57 = vrot.slane %v771_v55, 2  ;;  %v778_v58 = vrot.slane %v771_v55, 3  ;;  %v779_v5 = vrot.slane %v771_v55, 4  ;;  %v1638_v7 = vpop.f32.mrb[5].mxu0 }
 0x4ce   :  { %v780_v13 = vrot.slane %v771_v55, 5  ;;  %v781_v59 = vrot.slane %v771_v55, 6  ;;  %v791_v16 = vadd.f32 %v771_v55, %v658_v50  ;;  %v782_v60 = vrot.slane %v771_v55, 7  ;;  %v995_v50 = vld [vmem:[#allocation6 + $0x78] sm:$0xff] }
 0x4cf   :  { %v792_v61 = vadd.f32 %v776_v56, %v659_v51  ;;  %v793_v62 = vadd.f32 %v777_v57, %v660_v52  ;;  %v794_v19 = vadd.f32 %v778_v58, %v661_v53  ;;  %v795_v2 = vadd.f32 %v779_v5, %v662_v54  ;;  %v815_v52 = vld [vmem:[#allocation3 + $0x5] sm:$0x1]  ;;  %v816_v53 = vld [vmem:[#allocation3 + $0xd] sm:$0x1]  ;;  %v817_v54 = vld [vmem:[#allocation3 + $0x15] sm:$0x1] }
 0x4d0   :  { %2008 = vtanh.f32 %v791_v16  ;;  %v796_v22 = vadd.f32 %v780_v13, %v663_v10  ;;  %v797_v4 = vadd.f32 %v781_v59, %v664_v63  ;;  %v798_v6 = vadd.f32 %v782_v60, %v665_v3  ;;  %v818_v55 = vld [vmem:[#allocation3 + $0x1d] sm:$0x1]  ;;  %v819_v56 = vld [vmem:[#allocation3 + $0x25] sm:$0x1]  ;;  %v820_v59 = vld [vmem:[#allocation3 + $0x2d] sm:$0x1] }
 0x4d1   :  { %2010 = vtanh.f32 %v792_v61 }
 0x4d2   :  { %2012 = vtanh.f32 %v793_v62 }
 0x4d3   :  { %2014 = vtanh.f32 %v794_v19 }
 0x4d4   :  { %2016 = vtanh.f32 %v795_v2  ;;  %v821_v2 = vld [vmem:[#allocation3 + $0x35] sm:$0x1] }
 0x4d5   :  { %2018 = vtanh.f32 %v796_v22  ;;  %v822_v22 = vld [vmem:[#allocation3 + $0x3d] sm:$0x1] }
 0x4d6   :  { %2020 = vtanh.f32 %v797_v4 }
 0x4d7   :  { %2022 = vtanh.f32 %v798_v6 }
 0x4da   :  { %v2009_v8 = vpop.eup %2008 }
 0x4db   :  { %v2011_v25 = vpop.eup %2010  ;;  %807 = vst [vmem:[#allocation8 + $0x4] sm:$0x1] %v2009_v8 }
 0x4dc   :  { %v2013_v9 = vpop.eup %2012  ;;  %808 = vst [vmem:[#allocation8 + $0xc] sm:$0x1] %v2011_v25  ;;  %v847_v11 = vrot.slane %v2011_v25, 7 }
 0x4dd   :  { %v2015_v12 = vpop.eup %2014  ;;  %809 = vst [vmem:[#allocation8 + $0x14] sm:$0x1] %v2013_v9  ;;  %v849_v14 = vrot.slane %v2013_v9, 6 }
 0x4de   :  { %v2017_v15 = vpop.eup %2016  ;;  %810 = vst [vmem:[#allocation8 + $0x1c] sm:$0x1] %v2015_v12  ;;  %v848_v17 = vsel %vm213_vm1, %v847_v11, %v2009_v8  ;;  %v851_v18 = vrot.slane %v2015_v12, 5 }
 0x4df   :  { %v2019_v20 = vpop.eup %2018  ;;  %811 = vst [vmem:[#allocation8 + $0x24] sm:$0x1] %v2017_v15  ;;  %v850_v21 = vsel %vm216_vm2, %v849_v14, %v848_v17  ;;  %v853_v23 = vrot.slane %v2017_v15, 4 }
 0x4e0   :  { %v2021_v24 = vpop.eup %2020  ;;  %812 = vst [vmem:[#allocation8 + $0x2c] sm:$0x1] %v2019_v20  ;;  %v852_v26 = vsel %vm219_vm3, %v851_v18, %v850_v21  ;;  %v855_v27 = vrot.slane %v2019_v20, 3 }
 0x4e1   :  { %v2023_v28 = vpop.eup %2022  ;;  %813 = vst [vmem:[#allocation8 + $0x34] sm:$0x1] %v2021_v24  ;;  %v854_v29 = vsel %vm222_vm4, %v853_v23, %v852_v26  ;;  %v857_v30 = vrot.slane %v2021_v24, 2 }
 0x4e2   :  { %814 = vst [vmem:[#allocation8 + $0x3c] sm:$0x1] %v2023_v28  ;;  %v856_v31 = vsel %vm225_vm5, %v855_v27, %v854_v29  ;;  %v859_v32 = vrot.slane %v2023_v28, 1 }
 0x4e3   :  { %v858_v33 = vsel %vm228_vm6, %v857_v30, %v856_v31 }
 0x4e4   :  { %v860_v34 = vsel %vm231_vm7, %v859_v32, %v858_v33 }
 0x4e5   :  { %1672 = vmatmul.mubr.f32.vlgmr.msra.gmra.mrb[4].mxu1 %v860_v34 }
 0x4e6   :  { %1914 = vmatpush3.bf16.msra.mxu1 %v2354_v47  ;;  %1741 = vmatprep.mubr.msk.f32.mxu1 %vm2149_vm0, %v2150_v1  ;;  %v988_v1 = vld [vmem:[#allocation6 + $0x40] sm:$0xff]  ;;  %v993_v47 = vld [vmem:[#allocation6 + $0x68] sm:$0xff] }
 0x4e7   :  { %1915 = vmatprep.subr.bf16.mxu1 %v2148_v0  ;;  %v1901_v42 = vpack.c.bf16 %v989_v41, %v988_v1  ;;  %v1907_v48 = vpack.c.bf16 %v993_v47, %v992_v46  ;;  %v977_v46 = vld [vmem:[#allocation3 + $0x2e] sm:$0x1] }
 0x4e9   :  { %1902 = vmatpush3.bf16.msra.mxu0 %v1901_v42 }
 0x4ea   :  { %1917 = vmatpush3.bf16.msra.mxu1 %v2357_v49  ;;  %1903 = vmatprep.subr.bf16.mxu0 %v2148_v0  ;;  %v994_v49 = vld [vmem:[#allocation6 + $0x70] sm:$0xff] }
 0x4eb   :  { %1918 = vmatprep.subr.bf16.mxu1 %v2148_v0  ;;  %v1910_v51 = vpack.c.bf16 %v995_v50, %v994_v49 }
 0x4ed   :  { %1905 = vmatpush3.bf16.msra.mxu0 %v1904_v45 }
 0x4ee   :  { %1920 = vmatpush3.bf16.msra.mxu1 %v1895_v37  ;;  %1906 = vmatprep.subr.bf16.mxu0 %v2148_v0  ;;  %v973_v37 = vld [vmem:[#allocation3 + $0xe] sm:$0x1] }
 0x4ef   :  { %1921 = vmatprep.subr.bf16.mxu1 %v2148_v0 }
 0x4f1   :  { %1908 = vmatpush3.bf16.msra.mxu0 %v1907_v48 }
 0x4f2   :  { %1923 = vmatpush3.bf16.msra.mxu1 %v1898_v40  ;;  %1909 = vmatprep.subr.bf16.mxu0 %v2148_v0  ;;  %v976_v40 = vld [vmem:[#allocation3 + $0x26] sm:$0x1] }
 0x4f3   :  { %1924 = vmatprep.subr.bf16.mxu1 %v2148_v0 }
 0x4f5   :  { %1911 = vmatpush3.bf16.msra.mxu0 %v1910_v51 }
 0x4f6   :  { %1926 = vmatpush3.bf16.msra.mxu1 %v1901_v42 }
 0x4f7   :  { %1927 = vmatprep.subr.bf16.mxu1 %v2148_v0 }
 0x4fa   :  { %1929 = vmatpush3.bf16.msra.mxu1 %v1904_v45 }
 0x4fb   :  { %1930 = vmatprep.subr.bf16.mxu1 %v2148_v0 }
 0x4fe   :  { %1932 = vmatpush3.bf16.msra.mxu1 %v1907_v48 }
 0x4ff   :  { %1933 = vmatprep.subr.bf16.mxu1 %v2148_v0 }
 0x502   :  { %1935 = vmatpush3.bf16.msra.mxu1 %v1910_v51 }
 0x5b8   :  { %v928_v57 = vpop.f32.mrb[4].mxu1 }
 0x5b9   :  { %v933_v58 = vrot.slane %v928_v57, 1  ;;  %v934_v5 = vrot.slane %v928_v57, 2  ;;  %v935_v7 = vrot.slane %v928_v57, 3  ;;  %v936_v10 = vrot.slane %v928_v57, 4  ;;  %v1673_v13 = vpop.f32.mrb[5].mxu1 }
 0x5ba   :  { %v937_v16 = vrot.slane %v928_v57, 5  ;;  %v938_v60 = vrot.slane %v928_v57, 6  ;;  %v948_v61 = vadd.f32 %v928_v57, %v815_v52  ;;  %v939_v62 = vrot.slane %v928_v57, 7 }
 0x5bb   :  { %v949_v19 = vadd.f32 %v933_v58, %v816_v53  ;;  %v950_v0 = vadd.f32 %v934_v5, %v817_v54  ;;  %v951_v63 = vadd.f32 %v935_v7, %v818_v55  ;;  %v952_v3 = vadd.f32 %v936_v10, %v819_v56  ;;  %v978_v54 = vld [vmem:[#allocation3 + $0x36] sm:$0x1]  ;;  %v979_v56 = vld [vmem:[#allocation3 + $0x3e] sm:$0x1] }
 0x5bc   :  { %2024 = vtanh.f32 %v948_v61  ;;  %v953_v4 = vadd.f32 %v937_v16, %v820_v59  ;;  %v954_v6 = vadd.f32 %v938_v60, %v821_v2  ;;  %v955_v8 = vadd.f32 %v939_v62, %v822_v22 }
 0x5bd   :  { %2026 = vtanh.f32 %v949_v19 }
 0x5be   :  { %2028 = vtanh.f32 %v950_v0 }
 0x5bf   :  { %2030 = vtanh.f32 %v951_v63 }
 0x5c0   :  { %2032 = vtanh.f32 %v952_v3 }
 0x5c1   :  { %2034 = vtanh.f32 %v953_v4 }
 0x5c2   :  { %2036 = vtanh.f32 %v954_v6 }
 0x5c3   :  { %2038 = vtanh.f32 %v955_v8 }
 0x5c6   :  { %v2025_v25 = vpop.eup %2024 }
 0x5c7   :  { %v2027_v9 = vpop.eup %2026  ;;  %964 = vst [vmem:[#allocation8 + $0x5] sm:$0x1] %v2025_v25 }
 0x5c8   :  { %v2029_v11 = vpop.eup %2028  ;;  %965 = vst [vmem:[#allocation8 + $0xd] sm:$0x1] %v2027_v9  ;;  %v1004_v12 = vrot.slane %v2027_v9, 7 }
 0x5c9   :  { %v2031_v14 = vpop.eup %2030  ;;  %966 = vst [vmem:[#allocation8 + $0x15] sm:$0x1] %v2029_v11  ;;  %v1006_v15 = vrot.slane %v2029_v11, 6 }
 0x5ca   :  { %v2033_v17 = vpop.eup %2032  ;;  %967 = vst [vmem:[#allocation8 + $0x1d] sm:$0x1] %v2031_v14  ;;  %v1005_v18 = vsel %vm213_vm1, %v1004_v12, %v2025_v25  ;;  %v1008_v20 = vrot.slane %v2031_v14, 5 }
 0x5cb   :  { %v2035_v21 = vpop.eup %2034  ;;  %968 = vst [vmem:[#allocation8 + $0x25] sm:$0x1] %v2033_v17  ;;  %v1007_v23 = vsel %vm216_vm2, %v1006_v15, %v1005_v18  ;;  %v1010_v24 = vrot.slane %v2033_v17, 4  ;;  %v1129_v15 = vld [vmem:[#allocation3 + $0x7] sm:$0x1] }
 0x5cc   :  { %v2037_v26 = vpop.eup %2036  ;;  %969 = vst [vmem:[#allocation8 + $0x2d] sm:$0x1] %v2035_v21  ;;  %v1009_v27 = vsel %vm219_vm3, %v1008_v20, %v1007_v23  ;;  %v1012_v28 = vrot.slane %v2035_v21, 3  ;;  %v1130_v17 = vld [vmem:[#allocation3 + $0xf] sm:$0x1] }
 0x5cd   :  { %v2039_v29 = vpop.eup %2038  ;;  %970 = vst [vmem:[#allocation8 + $0x35] sm:$0x1] %v2037_v26  ;;  %v1011_v30 = vsel %vm222_vm4, %v1010_v24, %v1009_v27  ;;  %v1014_v31 = vrot.slane %v2037_v26, 2  ;;  %v1131_v18 = vld [vmem:[#allocation3 + $0x17] sm:$0x1] }
 0x5ce   :  { %971 = vst [vmem:[#allocation8 + $0x3d] sm:$0x1] %v2039_v29  ;;  %v1013_v32 = vsel %vm225_vm5, %v1012_v28, %v1011_v30  ;;  %v1016_v33 = vrot.slane %v2039_v29, 1  ;;  %v1132_v20 = vld [vmem:[#allocation3 + $0x1f] sm:$0x1] }
 0x5cf   :  { %v1015_v34 = vsel %vm228_vm6, %v1014_v31, %v1013_v32  ;;  %v1133_v21 = vld [vmem:[#allocation3 + $0x27] sm:$0x1]  ;;  %v1134_v30 = vld [vmem:[#allocation3 + $0x2f] sm:$0x1] }
 0x5d0   :  { %v1017_v35 = vsel %vm231_vm7, %v1016_v33, %v1015_v34  ;;  %v1135_v34 = vld [vmem:[#allocation3 + $0x37] sm:$0x1] }
 0x5d1   :  { %1707 = vmatmul.mubr.f32.vlgmr.msra.gmra.mrb[6].mxu0 %v1017_v35 }
 0x6a4   :  { %v1085_v1 = vpop.f32.mrb[6].mxu0 }
 0x6a5   :  { %v1090_v41 = vrot.slane %v1085_v1, 1  ;;  %v1091_v42 = vrot.slane %v1085_v1, 2  ;;  %v1092_v43 = vrot.slane %v1085_v1, 3  ;;  %v1093_v44 = vrot.slane %v1085_v1, 4  ;;  %v1708_v45 = vpop.f32.mrb[7].mxu0 }
 0x6a6   :  { %v1094_v47 = vrot.slane %v1085_v1, 5  ;;  %v1095_v48 = vrot.slane %v1085_v1, 6  ;;  %v1105_v49 = vadd.f32 %v1085_v1, %v972_v36  ;;  %v1096_v50 = vrot.slane %v1085_v1, 7 }
 0x6a7   :  { %v1106_v51 = vadd.f32 %v1090_v41, %v973_v37  ;;  %v1107_v52 = vadd.f32 %v1091_v42, %v974_v38  ;;  %v1108_v53 = vadd.f32 %v1092_v43, %v975_v39  ;;  %v1109_v55 = vadd.f32 %v1093_v44, %v976_v40  ;;  %v1136_v39 = vld [vmem:[#allocation3 + $0x3f] sm:$0x1] }
 0x6a8   :  { %2040 = vtanh.f32 %v1105_v49  ;;  %v1110_v57 = vadd.f32 %v1094_v47, %v977_v46  ;;  %v1111_v58 = vadd.f32 %v1095_v48, %v978_v54  ;;  %v1112_v5 = vadd.f32 %v1096_v50, %v979_v56 }
 0x6a9   :  { %2042 = vtanh.f32 %v1106_v51 }
 0x6aa   :  { %2044 = vtanh.f32 %v1107_v52 }
 0x6ab   :  { %2046 = vtanh.f32 %v1108_v53 }
 0x6ac   :  { %2048 = vtanh.f32 %v1109_v55 }
 0x6ad   :  { %2050 = vtanh.f32 %v1110_v57 }
 0x6ae   :  { %2052 = vtanh.f32 %v1111_v58 }
 0x6af   :  { %2054 = vtanh.f32 %v1112_v5 }
 0x6b2   :  { %v2041_v7 = vpop.eup %2040 }
 0x6b3   :  { %v2043_v10 = vpop.eup %2042  ;;  %1121 = vst [vmem:[#allocation8 + $0x6] sm:$0x1] %v2041_v7 }
 0x6b4   :  { %v2045_v13 = vpop.eup %2044  ;;  %1122 = vst [vmem:[#allocation8 + $0xe] sm:$0x1] %v2043_v10  ;;  %v1161_v59 = vrot.slane %v2043_v10, 7 }
 0x6b5   :  { %v2047_v16 = vpop.eup %2046  ;;  %1123 = vst [vmem:[#allocation8 + $0x16] sm:$0x1] %v2045_v13  ;;  %v1163_v60 = vrot.slane %v2045_v13, 6 }
 0x6b6   :  { %v2049_v61 = vpop.eup %2048  ;;  %1124 = vst [vmem:[#allocation8 + $0x1e] sm:$0x1] %v2047_v16  ;;  %v1162_v62 = vsel %vm213_vm1, %v1161_v59, %v2041_v7  ;;  %v1165_v19 = vrot.slane %v2047_v16, 5 }
 0x6b7   :  { %v2051_v0 = vpop.eup %2050  ;;  %1125 = vst [vmem:[#allocation8 + $0x26] sm:$0x1] %v2049_v61  ;;  %v1164_v63 = vsel %vm216_vm2, %v1163_v60, %v1162_v62  ;;  %v1167_v2 = vrot.slane %v2049_v61, 4 }
 0x6b8   :  { %v2053_v3 = vpop.eup %2052  ;;  %1126 = vst [vmem:[#allocation8 + $0x2e] sm:$0x1] %v2051_v0  ;;  %v1166_v22 = vsel %vm219_vm3, %v1165_v19, %v1164_v63  ;;  %v1169_v4 = vrot.slane %v2051_v0, 3 }
 0x6b9   :  { %v2055_v6 = vpop.eup %2054  ;;  %1127 = vst [vmem:[#allocation8 + $0x36] sm:$0x1] %v2053_v3  ;;  %v1168_v8 = vsel %vm222_vm4, %v1167_v2, %v1166_v22  ;;  %v1171_v25 = vrot.slane %v2053_v3, 2 }
 0x6ba   :  { %1128 = vst [vmem:[#allocation8 + $0x3e] sm:$0x1] %v2055_v6  ;;  %v1170_v9 = vsel %vm225_vm5, %v1169_v4, %v1168_v8  ;;  %v1173_v11 = vrot.slane %v2055_v6, 1 }
 0x6bb   :  { %v1172_v12 = vsel %vm228_vm6, %v1171_v25, %v1170_v9 }
 0x6bc   :  { %v1174_v14 = vsel %vm231_vm7, %v1173_v11, %v1172_v12 }
 0x6bd   :  { %1742 = vmatmul.mubr.f32.vlgmr.msra.gmra.mrb[6].mxu1 %v1174_v14 }
 0x790   :  { %v1242_v23 = vpop.f32.mrb[6].mxu1 }
 0x791   :  { %v1247_v24 = vrot.slane %v1242_v23, 1  ;;  %v1248_v26 = vrot.slane %v1242_v23, 2  ;;  %v1249_v27 = vrot.slane %v1242_v23, 3  ;;  %v1250_v28 = vrot.slane %v1242_v23, 4  ;;  %v1743_v29 = vpop.f32.mrb[7].mxu1 }
 0x792   :  { %v1251_v31 = vrot.slane %v1242_v23, 5  ;;  %v1252_v32 = vrot.slane %v1242_v23, 6  ;;  %v1262_v33 = vadd.f32 %v1242_v23, %v1129_v15  ;;  %v1253_v35 = vrot.slane %v1242_v23, 7 }
 0x793   :  { %v1263_v36 = vadd.f32 %v1247_v24, %v1130_v17  ;;  %v1264_v37 = vadd.f32 %v1248_v26, %v1131_v18  ;;  %v1265_v38 = vadd.f32 %v1249_v27, %v1132_v20  ;;  %v1266_v40 = vadd.f32 %v1250_v28, %v1133_v21 }
 0x794   :  { %2056 = vtanh.f32 %v1262_v33  ;;  %v1267_v1 = vadd.f32 %v1251_v31, %v1134_v30  ;;  %v1268_v41 = vadd.f32 %v1252_v32, %v1135_v34  ;;  %v1269_v42 = vadd.f32 %v1253_v35, %v1136_v39 }
 0x795   :  { %2058 = vtanh.f32 %v1263_v36 }
 0x796   :  { %2060 = vtanh.f32 %v1264_v37 }
 0x797   :  { %2062 = vtanh.f32 %v1265_v38 }
 0x798   :  { %2064 = vtanh.f32 %v1266_v40 }
 0x799   :  { %2066 = vtanh.f32 %v1267_v1 }
 0x79a   :  { %2068 = vtanh.f32 %v1268_v41 }
 0x79b   :  { %2070 = vtanh.f32 %v1269_v42 }
 0x79e   :  { %v2057_v43 = vpop.eup %2056 }
 0x79f   :  { %v2059_v44 = vpop.eup %2058  ;;  %1278 = vst [vmem:[#allocation8 + $0x7] sm:$0x1] %v2057_v43 }
 0x7a0   :  { %v2061_v45 = vpop.eup %2060  ;;  %1279 = vst [vmem:[#allocation8 + $0xf] sm:$0x1] %v2059_v44 }
 0x7a1   :  { %v2063_v46 = vpop.eup %2062  ;;  %1280 = vst [vmem:[#allocation8 + $0x17] sm:$0x1] %v2061_v45 }
 0x7a2   :  { %v2065_v47 = vpop.eup %2064  ;;  %1281 = vst [vmem:[#allocation8 + $0x1f] sm:$0x1] %v2063_v46 }
 0x7a3   :  { %v2067_v48 = vpop.eup %2066  ;;  %1282 = vst [vmem:[#allocation8 + $0x27] sm:$0x1] %v2065_v47 }
 0x7a4   :  { %v2069_v49 = vpop.eup %2068  ;;  %1283 = vst [vmem:[#allocation8 + $0x2f] sm:$0x1] %v2067_v48 }
 0x7a5   :  { %v2071_v50 = vpop.eup %2070  ;;  %1284 = vst [vmem:[#allocation8 + $0x37] sm:$0x1] %v2069_v49 }
 0x7a6   :  { %1285 = vst [vmem:[#allocation8 + $0x3f] sm:$0x1] %v2071_v50 }
 0x7a7   :  { %2127 = shalt.err (!%p2124_p6)
}
 0x7a8   :  { %s2128_s10 = scalar_lea.hbm %s2416_s2, 1024 }
 0x7a9   :  { %p2129_p7 = scmp.ne.s32.totalorder %s2416_s2, %s2128_s10  ;;  %p2132_p8 = scmp.lt.u32.totalorder %s2128_s10, %s2416_s2 }
 0x7ab   :  { %p2134_p9 = pnand %p2132_p8, %p2129_p7 }
 0x7ad   :  { %2137 = shalt.err (!%p2134_p9)
}
 0x7ae   :  { %1321 = dma.vmem_to_hbm [thread:$0]  %s1316_s6, 1024, %s2416_s2, [#allocation5], %s2145_s19, %s2145_s19, %s2146_s20  }
 0x7af   :  { %2142 = dma.done.wait [#allocation5], 1024  }
 0x7b0   :  { %2143 = vsyncadd [#allocation5], 4294966272 }
 0x7b1   :  { %1325 = vsyncpa [#allocation4], 1 }
 0x7b2   :  { %1326 = vsyncpa [#allocation7], 1 }
 0x7b3   :  { %1327 = vsyncpa [#allocation5], 1 }

</bundles_post_ra>
